<compile_context>
chip_gen: v5e
topology: v5e:2x2
jax: 0.10.0
libtpu: 0.0.40
codegen_flags: <defaults>
</compile_context>

<pallas_src>
import functools

import jax
import jax.numpy as jnp
from jax import lax
from jax.experimental import pallas as pl
from jax.experimental.pallas import tpu as pltpu


_SQRT_HALF = 0.7071067811865476


def _round_up(x, m):
    return ((x + m - 1) // m) * m


def _single_buffer_supported():
    # Capability probe: pipeline_mode / Buffered may not exist on older jax.
    try:
        pl.BlockSpec((8, 128), lambda i: (0, 0), pipeline_mode=pl.Buffered(1))
        return True
    except Exception:
        return False


_SINGLE_BUFFER_OK = _single_buffer_supported()


def _block_spec(shape, index_map, *, single_buffer=False):
    if single_buffer and _SINGLE_BUFFER_OK:
        return pl.BlockSpec(shape, index_map, pipeline_mode=pl.Buffered(1))
    return pl.BlockSpec(shape, index_map)


def _vmem_capacity_bytes():
    # 128 MiB on v5e/v6e, 64 MiB per TensorCore on v7x.
    try:
        return int(pltpu.get_tpu_info().vmem_capacity_bytes)
    except Exception:
        return 64 * 1024 * 1024          # conservative fallback (v7x-sized)


def _device_kind():
    try:
        return jax.devices()[0].device_kind.lower()
    except Exception:
        return ""


def _mlp_kernel(x_ref, w1_ref, b1_ref, w2_ref, b2_ref, o_ref, acc_ref, *,
                th, n_k):
    # Grid: (token tiles ["parallel"], hidden chunks ["arbitrary"/reduction]).
    # x_ref : (tm, E_pad)   token tile (model dtype)  -- reused across k
    # w1_ref: (E_pad, th)   fc1 weight chunk          -- resident when n_k==1
    # b1_ref: (1, H_pad)    full fc1 bias row         -- resident
    # w2_ref: (th, E_pad)   fc2 weight chunk          -- resident when n_k==1
    # b2_ref: (1, E_pad)    fc2 bias                  -- resident
    # o_ref : (tm, E_pad)   output tile
    # acc_ref: f32 accumulator (only used when n_k > 1)
    k = pl.program_id(1)

    # fc1 chunk: MXU matmul in the model dtype, f32 accumulate.
    h = jnp.dot(x_ref[...], w1_ref[...], preferred_element_type=jnp.float32)
    if n_k == 1:                       # static: single hidden step
        b1c = b1_ref[...]
    else:                              # static: streaming -> slice resident row
        start = pl.multiple_of(k * th, 256)
        b1c = b1_ref[:, pl.ds(start, th)]
    h = h + b1c.astype(jnp.float32)
    # Exact (erf) GELU, matching torch.nn.GELU() default.
    h = 0.5 * h * (1.0 + lax.erf(h * jnp.float32(_SQRT_HALF)))

    # fc2 chunk: activations cast back to the model dtype (keeps the MXU at
    # its bf16 rate when the model is bf16); accumulate in f32.
    part = jnp.dot(h.astype(x_ref.dtype), w2_ref[...],
                   preferred_element_type=jnp.float32)

    if n_k == 1:
        # Single hidden step: write straight through, no accumulator traffic.
        o_ref[...] = (part + b2_ref[...].astype(jnp.float32)).astype(o_ref.dtype)
    else:
        @pl.when(k == 0)
        def _init():
            # Seed the accumulator with b2 so finalize is just a cast+store.
            acc_ref[...] = jnp.broadcast_to(
                b2_ref[...].astype(jnp.float32), acc_ref.shape)

        acc_ref[...] += part

        @pl.when(k == n_k - 1)
        def _finalize():
            o_ref[...] = acc_ref[...].astype(o_ref.dtype)


def pad_mlp_params(w1, b1, w2, b2):
    """Zero-pad parameters to lane-aligned shapes ONCE at load time (hoisted
    out of the per-call forward path).  Padded rows/cols contribute zero."""
    E, H = w1.shape
    E_pad = _round_up(E, 128)
    H_pad = _round_up(H, 256)          # 256: match v6e/v7x MXU tile
    w1p = jnp.pad(w1, ((0, E_pad - E), (0, H_pad - H)))
    b1p = jnp.pad(jnp.reshape(b1, (1, H)), ((0, 0), (0, H_pad - H)))
    w2p = jnp.pad(w2, ((0, H_pad - H), (0, E_pad - E)))
    b2p = jnp.pad(jnp.reshape(b2, (1, E)), ((0, 0), (0, E_pad - E)))
    return w1p, b1p, w2p, b2p


@functools.partial(jax.jit, static_argnames=("tm", "th"))
def mlp_forward(x, w1, b1, w2, b2, *, tm=None, th=None):
    """x: (B, S, E) -> (B, S, E).  Weights use y = x @ W + b convention
    (torch weights transposed); weights may be pre-padded via pad_mlp_params."""
    B, S, E = x.shape
    Ew, Hw = w1.shape
    assert w2.shape == (Hw, Ew) and Ew >= E
    b1 = jnp.reshape(b1, (1, -1))
    b2 = jnp.reshape(b2, (1, -1))
    assert b1.shape[1] == Hw and b2.shape[1] == Ew
    N = B * S

    dtype = x.dtype
    itemsize = jnp.dtype(dtype).itemsize
    row_align = {4: 8, 2: 16, 1: 32}.get(itemsize, 8)

    # Lane-dense padding targets.
    E_pad = _round_up(Ew, 128)
    H_pad = _round_up(Hw, 256)

    # ---- generation-aware VMEM budget -------------------------------------
    vmem_cap = _vmem_capacity_bytes()
    vmem_limit = int(min(0.85 * vmem_cap, vmem_cap - (6 << 20)))  # headroom
    budget = int(0.75 * vmem_limit)      # tiles must fit well under the limit

    big_weights = 2 * E_pad * H_pad * itemsize >= (4 << 20)
    w_buf = 1 if (_SINGLE_BUFFER_OK and big_weights) else 2

    def _tok_bytes(t):
        # x (2 bufs) + out (2 bufs) in model dtype + f32 accumulator.
        return t * E_pad * (4 * itemsize + 4)

    # Resident-weight footprint (single-buffered when supported & worthwhile).
    resident_bytes = (w_buf * 2 * E_pad * H_pad
                      + 8 * H_pad + 8 * E_pad) * itemsize

    # ---- token tile (tm) ---------------------------------------------------
    if tm is None:
        tm = 256 if N >= 256 else _round_up(max(N, 1), row_align)
        if resident_bytes + _tok_bytes(tm) > budget:
            # Weights must stream: raise tm so arithmetic intensity
            # (~tm flop per streamed weight byte) clears the HBM roofline.
            tm_target = 768 if "v6" in _device_kind() else 512
            tm = min(tm_target, _round_up(max(N, 1), row_align))
            while tm > 256 and _tok_bytes(tm) > 0.4 * budget:
                tm -= 256
        # Prefer an even number of token tiles (v7x megacore split).
        n_tiles = -(-N // tm)
        if n_tiles >= 3 and n_tiles % 2 == 1:
            tm_even = _round_up(-(-N // (n_tiles + 1)), row_align)
            if 0 < tm_even <= tm:
                tm = tm_even
    assert tm >= row_align and tm % row_align == 0
    N_pad = _round_up(N, tm)

    # ---- hidden chunk (th) -------------------------------------------------
    if th is None:
        if resident_bytes + _tok_bytes(tm) <= budget:
            th = H_pad                     # weights fully VMEM-resident
        else:
            chunk_budget = max(budget - _tok_bytes(tm),
                               4 * E_pad * itemsize * 256)
            th = (chunk_budget // (4 * E_pad * itemsize)) // 256 * 256
            th = max(256, min(th, H_pad))
            while H_pad % th != 0:
                th -= 256
    assert th % 128 == 0 and H_pad % th == 0
    n_k = H_pad // th
    single_k = (n_k == 1)

    # ---- padding (per-call only where unavoidable; weights should already
    #      be pre-padded via pad_mlp_params) --------------------------------
    x2 = x.reshape(N, E)
    if N_pad != N or E_pad != E:
        x2 = jnp.pad(x2, ((0, N_pad - N), (0, E_pad - E)))
    if w1.shape != (E_pad, H_pad):
        w1 = jnp.pad(w1, ((0, E_pad - Ew), (0, H_pad - Hw)))
    if w2.shape != (H_pad, E_pad):
        w2 = jnp.pad(w2, ((0, H_pad - Hw), (0, E_pad - Ew)))
    if b1.shape[1] != H_pad:
        b1 = jnp.pad(b1, ((0, 0), (0, H_pad - Hw)))
    if b2.shape[1] != E_pad:
        b2 = jnp.pad(b2, ((0, 0), (0, E_pad - Ew)))

    grid = (N_pad // tm, n_k)
    sb_weights = single_k and big_weights   # grid-invariant -> single buffer
    sb_bias = big_weights                   # always grid-invariant

    kernel = functools.partial(_mlp_kernel, th=th, n_k=n_k)
    acc_shape = (tm, E_pad) if not single_k else (8, 128)  # dummy when unused

    cost = pl.CostEstimate(
        flops=4 * N_pad * E_pad * H_pad,               # two matmuls
        transcendentals=N_pad * H_pad,                 # erf
        bytes_accessed=(N_pad * E_pad * 2 + 2 * E_pad * H_pad
                        + H_pad + E_pad) * itemsize)

    out2 = pl.pallas_call(
        kernel,
        out_shape=jax.ShapeDtypeStruct((N_pad, E_pad), dtype),
        grid_spec=pltpu.PrefetchScalarGridSpec(
            num_scalar_prefetch=0,
            grid=grid,
            in_specs=[
                pl.BlockSpec((tm, E_pad), lambda i, k: (i, 0)),      # x tile
                _block_spec((E_pad, th), lambda i, k: (0, k),
                            single_buffer=sb_weights),               # W1
                _block_spec((1, H_pad), lambda i, k: (0, 0),
                            single_buffer=sb_bias),                  # b1 (full)
                _block_spec((th, E_pad), lambda i, k: (k, 0),
                            single_buffer=sb_weights),               # W2
                _block_spec((1, E_pad), lambda i, k: (0, 0),
                            single_buffer=sb_bias),                  # b2
            ],
            out_specs=pl.BlockSpec((tm, E_pad), lambda i, k: (i, 0)),
            scratch_shapes=[pltpu.VMEM(acc_shape, jnp.float32)],
        ),
        compiler_params=pltpu.CompilerParams(
            dimension_semantics=("parallel", "arbitrary"),
            vmem_limit_bytes=vmem_limit,
        ),
        cost_estimate=cost,
    )(x2, w1, b1, w2, b2)

    # TODO(synk): dropout omitted (inference-mode identity); training-mode
    # dropout would use pltpu.prng_seed / pltpu.prng_random_bits in-kernel.
    return out2[:N, :E].reshape(B, S, E)


def init_mlp_params(key, embedding_dim, dtype=jnp.float32):
    """Deterministic init mirroring nn.Linear shapes (stored transposed:
    y = x @ W + b)."""
    hidden = 4 * embedding_dim
    k1, k2, k3, k4 = jax.random.split(key, 4)
    bound1 = 1.0 / jnp.sqrt(embedding_dim)
    bound2 = 1.0 / jnp.sqrt(hidden)
    w1 = jax.random.uniform(k1, (embedding_dim, hidden), dtype, -bound1, bound1)
    b1 = jax.random.uniform(k2, (1, hidden), dtype, -bound1, bound1)
    w2 = jax.random.uniform(k3, (hidden, embedding_dim), dtype, -bound2, bound2)
    b2 = jax.random.uniform(k4, (1, embedding_dim), dtype, -bound2, bound2)
    return w1, b1, w2, b2


if __name__ == "__main__":
    key = jax.random.PRNGKey(0)
    kx, kp = jax.random.split(key)

    B, S, E = 2, 8, 32          # embedding_dim=32 -> hidden=128
    x = jax.random.normal(kx, (B, S, E), dtype=jnp.float32)
    w1, b1, w2, b2 = init_mlp_params(kp, E)

    # Pad parameters once at load time (hoisted out of the per-call path).
    w1p, b1p, w2p, b2p = pad_mlp_params(w1, b1, w2, b2)

    out = jax.block_until_ready(mlp_forward(x, w1p, b1p, w2p, b2p))

    # Pure-JAX reference check (exact erf GELU) against the UNPADDED params.
    h_ref = x @ w1 + b1[0]
    h_ref = 0.5 * h_ref * (1.0 + lax.erf(h_ref / jnp.sqrt(2.0)))
    ref = h_ref @ w2 + b2[0]
    assert out.shape == (B, S, E)
    assert jnp.max(jnp.abs(out - ref)) < 5e-4
    print("KERNEL_OK")
</pallas_src>

<mosaic_0001>
module attributes {stable_mosaic.version = 11 : i64} {
  func.func @_mlp_kernel(%arg0: i32, %arg1: i32, %arg2: memref<16x128xf32, #tpu.memory_space<vmem>>, %arg3: memref<128x256xf32, #tpu.memory_space<vmem>>, %arg4: memref<1x256xf32, #tpu.memory_space<vmem>>, %arg5: memref<256x128xf32, #tpu.memory_space<vmem>>, %arg6: memref<1x128xf32, #tpu.memory_space<vmem>>, %arg7: memref<16x128xf32, #tpu.memory_space<vmem>>, %arg8: memref<8x128xf32, #tpu.memory_space<vmem>>) attributes {dimension_semantics = [#tpu.dimension_semantics<parallel>, #tpu.dimension_semantics<arbitrary>], iteration_bounds = array<i64: 1, 1>, scalar_prefetch = 0 : i64, scratch_operands = 1 : i64, tpu.core_type = #tpu.core_type<tc>, window_params = [{transform_indices = @transform_0, window_bounds = array<i64: 16, 128>}, {transform_indices = @transform_1, window_bounds = array<i64: 128, 256>}, {pipeline_mode = #tpu.pipeline_mode<synchronous>, transform_indices = @transform_2, window_bounds = array<i64: 1, 256>}, {transform_indices = @transform_3, window_bounds = array<i64: 256, 128>}, {pipeline_mode = #tpu.pipeline_mode<synchronous>, transform_indices = @transform_4, window_bounds = array<i64: 1, 128>}, {transform_indices = @transform_5, window_bounds = array<i64: 16, 128>}]} {
    %c0 = arith.constant 0 : index
    %c0_0 = arith.constant 0 : index
    %0 = vector.load %arg2[%c0, %c0_0] : memref<16x128xf32, #tpu.memory_space<vmem>>, vector<16x128xf32>
    %c0_1 = arith.constant 0 : index
    %c0_2 = arith.constant 0 : index
    %1 = vector.load %arg3[%c0_1, %c0_2] : memref<128x256xf32, #tpu.memory_space<vmem>>, vector<128x256xf32>
    %cst = arith.constant dense<0.000000e+00> : vector<16x256xf32>
    %2 = tpu.matmul %0, %1, %cst {dimension_numbers = #tpu.dot_dimension_numbers<[1], [0], [0], [1], [0, 0, 1, 1], [], []>} : vector<16x128xf32>, vector<128x256xf32>, vector<16x256xf32> -> vector<16x256xf32>
    %c0_3 = arith.constant 0 : index
    %c0_4 = arith.constant 0 : index
    %3 = vector.load %arg4[%c0_3, %c0_4] : memref<1x256xf32, #tpu.memory_space<vmem>>, vector<1x256xf32>
    %4 = vector.broadcast %3 : vector<1x256xf32> to vector<16x256xf32>
    %5 = arith.addf %2, %4 : vector<16x256xf32>
    %cst_5 = arith.constant 5.000000e-01 : f32
    %6 = vector.broadcast %cst_5 : f32 to vector<16x256xf32>
    %7 = arith.mulf %6, %5 : vector<16x256xf32>
    %cst_6 = arith.constant 0.707106769 : f32
    %8 = vector.broadcast %cst_6 : f32 to vector<16x256xf32>
    %9 = arith.mulf %5, %8 : vector<16x256xf32>
    %10 = math.erf %9 : vector<16x256xf32>
    %cst_7 = arith.constant 1.000000e+00 : f32
    %11 = vector.broadcast %cst_7 : f32 to vector<16x256xf32>
    %12 = arith.addf %11, %10 : vector<16x256xf32>
    %13 = arith.mulf %7, %12 : vector<16x256xf32>
    %c0_8 = arith.constant 0 : index
    %c0_9 = arith.constant 0 : index
    %14 = vector.load %arg5[%c0_8, %c0_9] : memref<256x128xf32, #tpu.memory_space<vmem>>, vector<256x128xf32>
    %cst_10 = arith.constant dense<0.000000e+00> : vector<16x128xf32>
    %15 = tpu.matmul %13, %14, %cst_10 {dimension_numbers = #tpu.dot_dimension_numbers<[1], [0], [0], [1], [0, 0, 1, 1], [], []>} : vector<16x256xf32>, vector<256x128xf32>, vector<16x128xf32> -> vector<16x128xf32>
    %c0_11 = arith.constant 0 : index
    %c0_12 = arith.constant 0 : index
    %16 = vector.load %arg6[%c0_11, %c0_12] : memref<1x128xf32, #tpu.memory_space<vmem>>, vector<1x128xf32>
    %17 = vector.broadcast %16 : vector<1x128xf32> to vector<16x128xf32>
    %18 = arith.addf %15, %17 : vector<16x128xf32>
    %c0_13 = arith.constant 0 : index
    %c0_14 = arith.constant 0 : index
    %19 = vector.load %arg7[%c0_13, %c0_14] : memref<16x128xf32, #tpu.memory_space<vmem>>, vector<16x128xf32>
    tpu.vector_store %arg7[%c0_13, %c0_14], %18 {strides = array<i32>} : memref<16x128xf32, #tpu.memory_space<vmem>>, vector<16x128xf32>,
    return
  }
  func.func @transform_0(%arg0: i32, %arg1: i32) -> (i32, i32) {
    %c0_i32 = arith.constant 0 : i32
    %c0_i32_0 = arith.constant 0 : i32
    return %arg0, %c0_i32 : i32, i32
  }
  func.func @transform_1(%arg0: i32, %arg1: i32) -> (i32, i32) {
    %c0_i32 = arith.constant 0 : i32
    %c0_i32_0 = arith.constant 0 : i32
    return %c0_i32, %arg1 : i32, i32
  }
  func.func @transform_2(%arg0: i32, %arg1: i32) -> (i32, i32) {
    %c0_i32 = arith.constant 0 : i32
    %c0_i32_0 = arith.constant 0 : i32
    %c0_i32_1 = arith.constant 0 : i32
    return %c0_i32, %c0_i32_0 : i32, i32
  }
  func.func @transform_3(%arg0: i32, %arg1: i32) -> (i32, i32) {
    %c0_i32 = arith.constant 0 : i32
    %c0_i32_0 = arith.constant 0 : i32
    return %arg1, %c0_i32 : i32, i32
  }
  func.func @transform_4(%arg0: i32, %arg1: i32) -> (i32, i32) {
    %c0_i32 = arith.constant 0 : i32
    %c0_i32_0 = arith.constant 0 : i32
    %c0_i32_1 = arith.constant 0 : i32
    return %c0_i32, %c0_i32_0 : i32, i32
  }
  func.func @transform_5(%arg0: i32, %arg1: i32) -> (i32, i32) {
    %c0_i32 = arith.constant 0 : i32
    %c0_i32_0 = arith.constant 0 : i32
    return %arg0, %c0_i32 : i32, i32
  }
}

</mosaic_0001>

<bundles_post_ra>
// kernel: mlp_forward.1
= control target key start
LH: loop header
LB: loop body
LE: loop exit
PB: predicated region body
PF: predicated region fallthrough
CT: control target
= control target key end

     0   :  { %10 = vsyncpa [#allocation4], 0  ;;  %s633_s0 = inlined_call_operand.vmem [shape: f32[16,128], index: 0, kind: input, shape index: {}]   ;;  %s634_s1 = inlined_call_operand.hbm [shape: f32[128,256], index: 1, kind: input, shape index: {}]   ;;  %s635_s2 = inlined_call_operand.vmem [shape: f32[1,256], index: 2, kind: input, shape index: {}]   ;;  %s636_s3 = inlined_call_operand.hbm [shape: f32[256,128], index: 3, kind: input, shape index: {}]   ;;  %s637_s4 = inlined_call_operand.vmem [shape: f32[1,128], index: 4, kind: input, shape index: {}]   ;;  %s638_s5 = inlined_call_operand.vmem [shape: f32[16,128], index: 5, kind: output, shape index: {}]  }
   0x1   :  { %s18_s20 = sshll.u32 %s634_s1, 4  ;;  %s19_s20 = int_to_ptr.hbm [resolvable:$true] %s18_s20 }
   0x2   :  { %11 = vsyncpa [#allocation6], 0  ;;  %s475_s21 = smov [#allocation3]   ;;  %s33_s25 = sshll.u32 %s636_s3, 4  ;;  %s34_s25 = int_to_ptr.hbm [resolvable:$true] %s33_s25 }
   0x3   :  { %s20_s22 = sshll.u32 %s475_s21, 4  ;;  %s476_s26 = smov 256   ;;  %s21_s22 = int_to_ptr.vmem [resolvable:$true] %s20_s22 }
   0x4   :  { %s477_s27 = smov 16   ;;  %s478_s28 = smov [#allocation5]  }
   0x5   :  { %26 = dma.hbm_to_vmem [thread:$0]  %s19_s20, 4096, %s21_s22, [#allocation4], %s476_s26, %s476_s26, %s477_s27  }
   0x6   :  { %s35_s29 = sshll.u32 %s478_s28, 4  ;;  %s479_s30 = smov 128   ;;  %s36_s29 = int_to_ptr.vmem [resolvable:$true] %s35_s29 }
   0x7   :  { %s480_s6 = smov 8  }
   0x8   :  { %41 = dma.hbm_to_vmem [thread:$0]  %s34_s25, 4096, %s36_s29, [#allocation6], %s479_s30, %s479_s30, %s480_s6  }
   0x9   :  { %471 = dma.done.wait [#allocation4], 4096  }
   0xa   :  { %472 = vsyncadd [#allocation4], 4294963200 }
   0xb   :  { %473 = dma.done.wait [#allocation6], 4096  }
   0xc   :  { %474 = vsyncadd [#allocation6], 4294963200  ;;  %v84_v0 = vld [vmem:[#allocation3 + $0xf0] sm:$0xff]  ;;  %v85_v1 = vld [vmem:[#allocation3 + $0xf8] sm:$0xff] }
   0xd   :  { %v82_v2 = vld [vmem:[#allocation3 + $0xe0] sm:$0xff]  ;;  %92 = vmatpush.msra.mxu0 %v84_v0  ;;  %115 = vmatpush.msra.mxu1 %v85_v1  ;;  %v83_v3 = vld [vmem:[#allocation3 + $0xe8] sm:$0xff]  ;;  %v80_v4 = vld [vmem:[#allocation3 + $0xd0] sm:$0xff] }
   0xe   :  { %v81_v5 = vld [vmem:[#allocation3 + $0xd8] sm:$0xff]  ;;  %v78_v6 = vld [vmem:[#allocation3 + $0xc0] sm:$0xff]  ;;  %v79_v7 = vld [vmem:[#allocation3 + $0xc8] sm:$0xff] }
   0xf   :  { %93 = vmatpush.msra.mxu0 %v82_v2  ;;  %116 = vmatpush.msra.mxu1 %v83_v3  ;;  %v76_v8 = vld [vmem:[#allocation3 + $0xb0] sm:$0xff]  ;;  %v77_v9 = vld [vmem:[#allocation3 + $0xb8] sm:$0xff]  ;;  %v74_v10 = vld [vmem:[#allocation3 + $0xa0] sm:$0xff] }
  0x10   :  { %v75_v11 = vld [vmem:[#allocation3 + $0xa8] sm:$0xff]  ;;  %v72_v12 = vld [vmem:[#allocation3 + $0x90] sm:$0xff]  ;;  %v73_v13 = vld [vmem:[#allocation3 + $0x98] sm:$0xff] }
  0x11   :  { %94 = vmatpush.msra.mxu0 %v80_v4  ;;  %117 = vmatpush.msra.mxu1 %v81_v5  ;;  %v70_v14 = vld [vmem:[#allocation3 + $0x80] sm:$0xff]  ;;  %v71_v15 = vld [vmem:[#allocation3 + $0x88] sm:$0xff]  ;;  %v68_v16 = vld [vmem:[#allocation3 + $0x70] sm:$0xff] }
  0x12   :  { %v69_v17 = vld [vmem:[#allocation3 + $0x78] sm:$0xff]  ;;  %v66_v18 = vld [vmem:[#allocation3 + $0x60] sm:$0xff]  ;;  %v67_v19 = vld [vmem:[#allocation3 + $0x68] sm:$0xff] }
  0x13   :  { %95 = vmatpush.msra.mxu0 %v78_v6  ;;  %118 = vmatpush.msra.mxu1 %v79_v7  ;;  %v64_v20 = vld [vmem:[#allocation3 + $0x50] sm:$0xff]  ;;  %v65_v21 = vld [vmem:[#allocation3 + $0x58] sm:$0xff]  ;;  %v62_v22 = vld [vmem:[#allocation3 + $0x40] sm:$0xff] }
  0x14   :  { %v63_v23 = vld [vmem:[#allocation3 + $0x48] sm:$0xff]  ;;  %v60_v24 = vld [vmem:[#allocation3 + $0x30] sm:$0xff]  ;;  %v61_v25 = vld [vmem:[#allocation3 + $0x38] sm:$0xff] }
  0x15   :  { %96 = vmatpush.msra.mxu0 %v76_v8  ;;  %119 = vmatpush.msra.mxu1 %v77_v9  ;;  %v58_v26 = vld [vmem:[#allocation3 + $0x20] sm:$0xff]  ;;  %v59_v27 = vld [vmem:[#allocation3 + $0x28] sm:$0xff]  ;;  %v56_v28 = vld [vmem:[#allocation3 + $0x10] sm:$0xff] }
  0x16   :  { %v57_v29 = vld [vmem:[#allocation3 + $0x18] sm:$0xff]  ;;  %v54_v30 = vld [vmem:[#allocation3] sm:$0xff]  ;;  %v55_v31 = vld [vmem:[#allocation3 + $0x8] sm:$0xff] }
  0x17   :  { %97 = vmatpush.msra.mxu0 %v74_v10  ;;  %120 = vmatpush.msra.mxu1 %v75_v11  ;;  %v52_v32 = vld [vmem:[%s633_s0] sm:$0xff]  ;;  %v53_v33 = vld [vmem:[%s633_s0 + $0x8] sm:$0xff]  ;;  %v329_v34 = vld [vmem:[#allocation5 + $0x78] sm:$0xff] }
  0x18   :  { %v345_v35 = vld [vmem:[#allocation5 + $0xf8] sm:$0xff]  ;;  %350 = vmatpush.msra.mxu2 %v329_v34  ;;  %v328_v36 = vld [vmem:[#allocation5 + $0x70] sm:$0xff]  ;;  %v86_v38 = vld [vmem:[%s635_s2] sm:$0x3] }
  0x19   :  { %98 = vmatpush.msra.mxu0 %v72_v12  ;;  %121 = vmatpush.msra.mxu1 %v73_v13  ;;  %v344_v37 = vld [vmem:[#allocation5 + $0xf0] sm:$0xff]  ;;  %v327_v39 = vld [vmem:[#allocation5 + $0x68] sm:$0xff]  ;;  %v88_v41 = vperm.slane %v86_v38, 0  ;;  %v89_v42 = vperm.slane %v86_v38, 1  ;;  %v326_v43 = vld [vmem:[#allocation5 + $0x60] sm:$0xff] }
  0x1a   :  { %373 = vmatpush.msra.mxu3 %v345_v35  ;;  %351 = vmatpush.msra.mxu2 %v328_v36  ;;  %v343_v40 = vld [vmem:[#allocation5 + $0xe8] sm:$0xff]  ;;  %v342_v44 = vld [vmem:[#allocation5 + $0xe0] sm:$0xff]  ;;  %v325_v45 = vld [vmem:[#allocation5 + $0x58] sm:$0xff] }
  0x1b   :  { %99 = vmatpush.msra.mxu0 %v70_v14  ;;  %122 = vmatpush.msra.mxu1 %v71_v15  ;;  %v341_v46 = vld [vmem:[#allocation5 + $0xd8] sm:$0xff]  ;;  %v324_v51 = vld [vmem:[#allocation5 + $0x50] sm:$0xff]  ;;  %v323_v55 = vld [vmem:[#allocation5 + $0x48] sm:$0xff] }
  0x1c   :  { %374 = vmatpush.msra.mxu3 %v344_v37  ;;  %352 = vmatpush.msra.mxu2 %v327_v39  ;;  %v340_v52 = vld [vmem:[#allocation5 + $0xd0] sm:$0xff]  ;;  %v339_v56 = vld [vmem:[#allocation5 + $0xc8] sm:$0xff]  ;;  %v322_v59 = vld [vmem:[#allocation5 + $0x40] sm:$0xff] }
  0x1d   :  { %100 = vmatpush.msra.mxu0 %v68_v16  ;;  %123 = vmatpush.msra.mxu1 %v69_v17  ;;  %v338_v60 = vld [vmem:[#allocation5 + $0xc0] sm:$0xff]  ;;  %v321_v61 = vld [vmem:[#allocation5 + $0x38] sm:$0xff]  ;;  %v320_v3 = vld [vmem:[#allocation5 + $0x30] sm:$0xff] }
  0x1e   :  { %375 = vmatpush.msra.mxu3 %v343_v40  ;;  %353 = vmatpush.msra.mxu2 %v326_v43  ;;  %v337_v62 = vld [vmem:[#allocation5 + $0xb8] sm:$0xff]  ;;  %v336_v4 = vld [vmem:[#allocation5 + $0xb0] sm:$0xff]  ;;  %v319_v9 = vld [vmem:[#allocation5 + $0x28] sm:$0xff] }
  0x1f   :  { %101 = vmatpush.msra.mxu0 %v66_v18  ;;  %124 = vmatpush.msra.mxu1 %v67_v19  ;;  %v335_v10 = vld [vmem:[#allocation5 + $0xa8] sm:$0xff]  ;;  %v318_v16 = vld [vmem:[#allocation5 + $0x20] sm:$0xff] }
  0x20   :  { %376 = vmatpush.msra.mxu3 %v342_v44  ;;  %354 = vmatpush.msra.mxu2 %v325_v45  ;;  %v334_v17 = vld [vmem:[#allocation5 + $0xa0] sm:$0xff]  ;;  %v315_v38 = vld [vmem:[#allocation5 + $0x8] sm:$0xff] }
  0x21   :  { %102 = vmatpush.msra.mxu0 %v64_v20  ;;  %125 = vmatpush.msra.mxu1 %v65_v21  ;;  %v331_v39 = vld [vmem:[#allocation5 + $0x88] sm:$0xff] }
  0x22   :  { %377 = vmatpush.msra.mxu3 %v341_v46  ;;  %355 = vmatpush.msra.mxu2 %v324_v51  ;;  %v314_v46 = vld [vmem:[#allocation5] sm:$0xff] }
  0x23   :  { %103 = vmatpush.msra.mxu0 %v62_v22  ;;  %126 = vmatpush.msra.mxu1 %v63_v23 }
  0x24   :  { %378 = vmatpush.msra.mxu3 %v340_v52  ;;  %356 = vmatpush.msra.mxu2 %v323_v55 }
  0x25   :  { %104 = vmatpush.msra.mxu0 %v60_v24  ;;  %127 = vmatpush.msra.mxu1 %v61_v25  ;;  %v317_v24 = vld [vmem:[#allocation5 + $0x18] sm:$0xff] }
  0x26   :  { %379 = vmatpush.msra.mxu3 %v339_v56  ;;  %357 = vmatpush.msra.mxu2 %v322_v59  ;;  %v333_v25 = vld [vmem:[#allocation5 + $0x98] sm:$0xff] }
  0x27   :  { %105 = vmatpush.msra.mxu0 %v58_v26  ;;  %128 = vmatpush.msra.mxu1 %v59_v27 }
  0x28   :  { %380 = vmatpush.msra.mxu3 %v338_v60  ;;  %358 = vmatpush.msra.mxu2 %v321_v61 }
  0x29   :  { %106 = vmatpush.msra.mxu0 %v56_v28  ;;  %129 = vmatpush.msra.mxu1 %v57_v29 }
  0x2a   :  { %381 = vmatpush.msra.mxu3 %v337_v62  ;;  %359 = vmatpush.msra.mxu2 %v320_v3 }
  0x2b   :  { %107 = vmatpush.msra.mxu0 %v54_v30  ;;  %130 = vmatpush.msra.mxu1 %v55_v31 }
  0x2c   :  { %108 = vmatmul.f32.vlgmr.msra.gmra.mxu0 %v52_v32  ;;  %131 = vmatmul.f32.vlgmr.msra.gmra.mxu1 %v52_v32  ;;  %v316_v32 = vld [vmem:[#allocation5 + $0x10] sm:$0xff] }
  0x2d   :  { %382 = vmatpush.msra.mxu3 %v336_v4  ;;  %360 = vmatpush.msra.mxu2 %v319_v9 }
  0x2f   :  { %383 = vmatpush.msra.mxu3 %v335_v10  ;;  %361 = vmatpush.msra.mxu2 %v318_v16 }
  0x31   :  { %384 = vmatpush.msra.mxu3 %v334_v17  ;;  %362 = vmatpush.msra.mxu2 %v317_v24 }
  0x33   :  { %385 = vmatpush.msra.mxu3 %v333_v25  ;;  %363 = vmatpush.msra.mxu2 %v316_v32 }
  0x34   :  { %111 = vmatmul.f32.gmra.mxu0 %v53_v33  ;;  %134 = vmatmul.f32.gmra.mxu1 %v53_v33  ;;  %v332_v33 = vld [vmem:[#allocation5 + $0x90] sm:$0xff] }
  0x35   :  { %386 = vmatpush.msra.mxu3 %v332_v33  ;;  %364 = vmatpush.msra.mxu2 %v315_v38 }
  0x37   :  { %387 = vmatpush.msra.mxu3 %v331_v39  ;;  %365 = vmatpush.msra.mxu2 %v314_v46 }
  0xa9   :  { %v109_v47 = vpop.f32.mrf.mxu0  ;;  %v132_v48 = vpop.f32.mrf.mxu1 }
  0xaa   :  { %v526_v49 = vadd.f32 %v109_v47, %v88_v41  ;;  %v528_v50 = vadd.f32 %v132_v48, %v89_v42  ;;  %v330_v47 = vld [vmem:[#allocation5 + $0x80] sm:$0xff] }
  0xab   :  { %388 = vmatpush.msra.mxu3 %v330_v47 }
  0xac   :  { %v531_v53 = vmul.f32 0.70710677, %v526_v49  ;;  %v534_v54 = vmul.f32 0.70710677, %v528_v50 }
  0xae   :  { %v146_v57 = vmul.f32 %v531_v53, %v531_v53  ;;  %v186_v58 = vmul.f32 %v534_v54, %v534_v54 }
  0xb0   :  { %v540_v63 = vmin.f32 %v146_v57, 16.0  ;;  %v542_v0 = vmin.f32 %v186_v58, 16.0 }
  0xb1   :  { %v112_v1 = vpop.f32.mrf.mxu0  ;;  %v135_v2 = vpop.f32.mrf.mxu1 }
  0xb2   :  { %v148_v5 = vmul.f32 2.1237322e-06, %v540_v63  ;;  %v188_v6 = vmul.f32 2.1237322e-06, %v542_v0  ;;  %v546_v7 = vadd.f32 %v112_v1, %v88_v41  ;;  %v548_v8 = vadd.f32 %v135_v2, %v89_v42 }
  0xb3   :  { %v159_v11 = vmul.f32 3.8918573e-05, %v540_v63  ;;  %v199_v21 = vmul.f32 3.8918573e-05, %v542_v0 }
  0xb4   :  { %v149_v12 = vadd.f32 0.00028619796, %v148_v5  ;;  %v189_v13 = vadd.f32 0.00028619796, %v188_v6  ;;  %v552_v14 = vmul.f32 0.70710677, %v546_v7 }
  0xb5   :  { %v555_v15 = vmul.f32 0.70710677, %v548_v8  ;;  %v160_v20 = vadd.f32 0.001143296, %v159_v11  ;;  %v200_v29 = vadd.f32 0.001143296, %v199_v21 }
  0xb6   :  { %v150_v18 = vmul.f32 %v149_v12, %v540_v63  ;;  %v190_v19 = vmul.f32 %v189_v13, %v542_v0  ;;  %v226_v22 = vmul.f32 %v552_v14, %v552_v14 }
  0xb7   :  { %v266_v23 = vmul.f32 %v555_v15, %v555_v15  ;;  %v161_v28 = vmul.f32 %v160_v20, %v540_v63  ;;  %v201_v36 = vmul.f32 %v200_v29, %v542_v0 }
  0xb8   :  { %v151_v26 = vadd.f32 0.0036580483, %v150_v18  ;;  %v191_v27 = vadd.f32 0.0036580483, %v190_v19  ;;  %v565_v30 = vmin.f32 %v226_v22, 16.0 }
  0xb9   :  { %v567_v31 = vmin.f32 %v266_v23, 16.0  ;;  %v162_v35 = vadd.f32 0.014752088, %v161_v28  ;;  %v202_v44 = vadd.f32 0.014752088, %v201_v36 }
  0xba   :  { %v152_v34 = vmul.f32 %v151_v26, %v540_v63  ;;  %v228_v37 = vmul.f32 2.1237322e-06, %v565_v30  ;;  %v239_v40 = vmul.f32 3.8918573e-05, %v565_v30  ;;  %v192_v41 = vmul.f32 %v191_v27, %v542_v0 }
  0xbb   :  { %v268_v42 = vmul.f32 2.1237322e-06, %v567_v31  ;;  %v163_v43 = vmul.f32 %v162_v35, %v540_v63  ;;  %v203_v55 = vmul.f32 %v202_v44, %v542_v0  ;;  %v279_v58 = vmul.f32 3.8918573e-05, %v567_v31 }
  0xbc   :  { %v229_v45 = vadd.f32 0.00028619796, %v228_v37  ;;  %v240_v48 = vadd.f32 0.001143296, %v239_v40  ;;  %v153_v51 = vadd.f32 0.05243302, %v152_v34 }
  0xbd   :  { %v164_v52 = vadd.f32 0.112945676, %v163_v43  ;;  %v193_v59 = vadd.f32 0.05243302, %v192_v41  ;;  %v269_v60 = vadd.f32 0.00028619796, %v268_v42 }
  0xbe   :  { %v230_v56 = vmul.f32 %v229_v45, %v565_v30  ;;  %v241_v57 = vmul.f32 %v240_v48, %v565_v30  ;;  %v204_v62 = vadd.f32 0.112945676, %v203_v55  ;;  %v154_v3 = vmul.f32 %v153_v51, %v540_v63 }
  0xbf   :  { %v165_v61 = vmul.f32 %v164_v52, %v540_v63  ;;  %v280_v9 = vadd.f32 0.001143296, %v279_v58  ;;  %v194_v10 = vmul.f32 %v193_v59, %v542_v0  ;;  %v270_v11 = vmul.f32 %v269_v60, %v567_v31 }
  0xc0   :  { %v231_v1 = vadd.f32 0.0036580483, %v230_v56  ;;  %v242_v2 = vadd.f32 0.014752088, %v241_v57  ;;  %v205_v5 = vmul.f32 %v204_v62, %v542_v0  ;;  %v155_v19 = vadd.f32 0.18741608, %v154_v3 }
  0xc1   :  { %v166_v4 = vadd.f32 0.4994258, %v165_v61  ;;  %v281_v18 = vmul.f32 %v280_v9, %v567_v31  ;;  %v195_v24 = vadd.f32 0.18741608, %v194_v10  ;;  %v271_v25 = vadd.f32 0.0036580483, %v270_v11 }
  0xc2   :  { %v243_v6 = vmul.f32 %v242_v2, %v565_v30  ;;  %v206_v13 = vadd.f32 0.4994258, %v205_v5  ;;  %v232_v16 = vmul.f32 %v231_v1, %v565_v30  ;;  %v156_v29 = vmul.f32 %v155_v19, %v540_v63 }
  0xc3   :  { %v167_v12 = vmul.f32 %v166_v4, %v540_v63  ;;  %v282_v23 = vadd.f32 0.014752088, %v281_v18  ;;  %v196_v33 = vmul.f32 %v195_v24, %v542_v0  ;;  %v272_v34 = vmul.f32 %v271_v25, %v567_v31 }
  0xc4   :  { %v244_v17 = vadd.f32 0.112945676, %v243_v6  ;;  %v207_v21 = vmul.f32 %v206_v13, %v542_v0  ;;  %v233_v26 = vadd.f32 0.05243302, %v232_v16  ;;  %v157_v39 = vadd.f32 1.1283791, %v156_v29 }
  0xc5   :  { %v168_v20 = vadd.f32 1.0, %v167_v12  ;;  %v283_v28 = vmul.f32 %v282_v23, %v567_v31  ;;  %v197_v43 = vadd.f32 1.1283791, %v196_v33  ;;  %v273_v63 = vadd.f32 0.05243302, %v272_v34 }
  0xc6   :  { %v245_v22 = vmul.f32 %v244_v17, %v565_v30  ;;  %v208_v27 = vadd.f32 1.0, %v207_v21  ;;  %v234_v37 = vmul.f32 %v233_v26, %v565_v30  ;;  %v158_v47 = vmul.f32 %v157_v39, %v531_v53 }
  0xc7   :  { %415 = vrcp.f32 %v168_v20  ;;  %v284_v36 = vadd.f32 0.112945676, %v283_v28  ;;  %v180_v48 = vand.u32 2147483648, %v168_v20  ;;  %v178_v55 = vand.u32 2147483647, %v168_v20 }
  0xc8   :  { %v246_v32 = vadd.f32 0.4994258, %v245_v22  ;;  %417 = vrcp.f32 %v208_v27  ;;  %v235_v0 = vadd.f32 0.18741608, %v234_v37  ;;  %v198_v57 = vmul.f32 %v197_v43, %v534_v54 }
  0xc9   :  { %v285_v41 = vmul.f32 %v284_v36, %v567_v31  ;;  %v274_v58 = vmul.f32 %v273_v63, %v567_v31  ;;  %vm174_vm1 = vweird.f32 %v168_v20  ;;  %v220_v62 = vand.u32 2147483648, %v208_v27 }
  0xca   :  { %v247_v35 = vmul.f32 %v246_v32, %v565_v30  ;;  %v236_v60 = vmul.f32 %v235_v0, %v565_v30  ;;  %v181_v2 = vor.u32 1.1754944e-38, %v180_v48  ;;  %v218_v4 = vand.u32 2147483647, %v208_v27 }
  0xcb   :  { %v286_v46 = vadd.f32 0.4994258, %v285_v41  ;;  %vm179_vm4 = vcmp.eq.f32.partialorder %v178_v55, 8.507059e+37  ;;  %v275_v6 = vadd.f32 0.18741608, %v274_v58  ;;  %vm214_vm5 = vweird.f32 %v208_v27 }
  0xcc   :  { %v597_v40 = vadd.f32 1.0, %v247_v35  ;;  %v237_v30 = vadd.f32 1.1283791, %v236_v60  ;;  %v221_v12 = vor.u32 1.1754944e-38, %v220_v62  ;;  %vm219_vm7 = vcmp.eq.f32.partialorder %v218_v4, 8.507059e+37 }
  0xcd   :  { %v416_v38 = vpop.eup %415  ;;  %v287_v56 = vmul.f32 %v286_v46, %v567_v31  ;;  %v138_v22 = vmul.f32 0.5, %v526_v49  ;;  %v276_v25 = vmul.f32 %v275_v6, %v567_v31  ;;  %v139_v49 = vmul.f32 0.5, %v528_v50 }
  0xce   :  { %v170_v42 = vmul.f32 %v416_v38, %v168_v20  ;;  %419 = vrcp.f32 %v597_v40  ;;  %v418_v44 = vpop.eup %417  ;;  %vm175_vm0 = vweird.f32 %v416_v38  ;;  %v258_v17 = vand.u32 2147483647, %v597_v40 }
  0xcf   :  { %v210_v51 = vmul.f32 %v418_v44, %v208_v27  ;;  %v606_v1 = vadd.f32 1.0, %v287_v56  ;;  %vm176_vm2 = vmor %vm174_vm1, %vm175_vm0  ;;  %vm215_vm3 = vweird.f32 %v418_v44  ;;  %v260_v18 = vand.u32 2147483648, %v597_v40 }
  0xd0   :  { %v171_v45 = vsub.f32 1.0, %v170_v42  ;;  %vm216_vm6 = vmor %vm214_vm5, %vm215_vm3  ;;  %vm254_vm9 = vweird.f32 %v597_v40  ;;  %v238_v33 = vmul.f32 %v237_v30, %v552_v14  ;;  %vm259_vm11 = vcmp.eq.f32.partialorder %v258_v17, 8.507059e+37 }
  0xd1   :  { %v211_v59 = vsub.f32 1.0, %v210_v51  ;;  %421 = vrcp.f32 %v606_v1  ;;  %v261_v29 = vor.u32 1.1754944e-38, %v260_v18  ;;  %v277_v31 = vadd.f32 1.1283791, %v276_v25 }
  0xd2   :  { %v172_v52 = vmul.f32 %v416_v38, %v171_v45  ;;  %v298_v43 = vand.u32 2147483647, %v606_v1  ;;  %vm294_vm13 = vweird.f32 %v606_v1  ;;  %v140_v50 = vmul.f32 0.5, %v546_v7  ;;  %v414_v7 = vld [vmem:[%s637_s4] ss:$0 sm:$0xff] }
  0xd3   :  { %v212_v3 = vmul.f32 %v418_v44, %v211_v59  ;;  %v278_v45 = vmul.f32 %v277_v31, %v555_v15  ;;  %v141_v55 = vmul.f32 0.5, %v548_v8 }
  0xd4   :  { %v173_v61 = vadd.f32 %v416_v38, %v172_v52  ;;  %v420_v53 = vpop.eup %419  ;;  %vm299_vm15 = vcmp.eq.f32.partialorder %v298_v43, 8.507059e+37 }
  0xd5   :  { %v250_v54 = vmul.f32 %v420_v53, %v597_v40  ;;  %v213_v10 = vadd.f32 %v418_v44, %v212_v3  ;;  %vm255_vm8 = vweird.f32 %v420_v53  ;;  %v300_v40 = vand.u32 2147483648, %v606_v1 }
  0xd6   :  { %v177_v5 = vsel %vm176_vm2, %v416_v38, %v173_v61  ;;  %vm256_vm10 = vmor %vm254_vm9, %vm255_vm8 }
  0xd7   :  { %v182_v9 = vsel %vm179_vm4, %v181_v2, %v177_v5  ;;  %v251_v13 = vsub.f32 1.0, %v250_v54  ;;  %v217_v16 = vsel %vm216_vm6, %v418_v44, %v213_v10  ;;  %v422_v24 = vpop.eup %421  ;;  %v301_v0 = vor.u32 1.1754944e-38, %v300_v40 }
  0xd8   :  { %v183_v11 = vmul.f32 %v182_v9, %v158_v47  ;;  %v222_v20 = vsel %vm219_vm7, %v221_v12, %v217_v16  ;;  %v290_v32 = vmul.f32 %v422_v24, %v606_v1  ;;  %vm295_vm12 = vweird.f32 %v422_v24 }
  0xd9   :  { %v252_v21 = vmul.f32 %v420_v53, %v251_v13  ;;  %v223_v23 = vmul.f32 %v222_v20, %v198_v57  ;;  %vm296_vm14 = vmor %vm294_vm13, %vm295_vm12 }
  0xda   :  { %v404_v19 = vclamps-f32 %v183_v11, 1.0  ;;  %v291_v38 = vsub.f32 1.0, %v290_v32 }
  0xdb   :  { %v253_v27 = vadd.f32 %v420_v53, %v252_v21  ;;  %v405_v28 = vclamps-f32 %v223_v23, 1.0 }
  0xdc   :  { %v306_v26 = vadd.f32 1.0, %v404_v19  ;;  %v292_v42 = vmul.f32 %v422_v24, %v291_v38 }
  0xdd   :  { %v257_v35 = vsel %vm256_vm10, %v420_v53, %v253_v27  ;;  %v307_v36 = vadd.f32 1.0, %v405_v28 }
  0xde   :  { %v310_v34 = vmul.f32 %v306_v26, %v138_v22  ;;  %v262_v37 = vsel %vm259_vm11, %v261_v29, %v257_v35  ;;  %v293_v14 = vadd.f32 %v422_v24, %v292_v42 }
  0xdf   :  { %v263_v39 = vmul.f32 %v262_v37, %v238_v33  ;;  %v311_v41 = vmul.f32 %v307_v36, %v139_v49 }
  0xe0   :  { %366 = vmatmul.f32.vlgmr.msra.gmra.mxu2 %v310_v34  ;;  %v297_v46 = vsel %vm296_vm14, %v422_v24, %v293_v14 }
  0xe1   :  { %v406_v63 = vclamps-f32 %v263_v39, 1.0  ;;  %389 = vmatmul.f32.vlgmr.msra.gmra.mxu3 %v311_v41  ;;  %v302_v48 = vsel %vm299_vm15, %v301_v0, %v297_v46 }
  0xe2   :  { %v303_v51 = vmul.f32 %v302_v48, %v278_v45 }
  0xe3   :  { %v308_v44 = vadd.f32 1.0, %v406_v63 }
  0xe4   :  { %v407_v52 = vclamps-f32 %v303_v51, 1.0 }
  0xe5   :  { %v312_v47 = vmul.f32 %v308_v44, %v140_v50 }
  0xe6   :  { %v309_v56 = vadd.f32 1.0, %v407_v52 }
  0xe8   :  { %369 = vmatmul.f32.gmra.mxu2 %v312_v47  ;;  %v313_v57 = vmul.f32 %v309_v56, %v141_v55 }
  0xea   :  { %392 = vmatmul.f32.gmra.mxu3 %v313_v57 }
 0x163   :  { %v367_v58 = vpop.f32.mrf.mxu2 }
 0x164   :  { %v368_v59 = vadd.f32 %v414_v7, %v367_v58  ;;  %v390_v60 = vpop.f32.mrf.mxu3 }
 0x166   :  { %v391_v15 = vadd.f32 %v390_v60, %v368_v59 }
 0x168   :  { %396 = vst [vmem:[%s638_s5] sm:$0xff] %v391_v15 }
 0x16b   :  { %v370_v61 = vpop.f32.mrf.mxu2 }
 0x16c   :  { %v371_v62 = vadd.f32 %v414_v7, %v370_v61 }
 0x16d   :  { %v393_v1 = vpop.f32.mrf.mxu3 }
 0x16e   :  { %v394_v53 = vadd.f32 %v393_v1, %v371_v62 }
 0x170   :  { %397 = vst [vmem:[%s638_s5 + $0x8] sm:$0xff] %v394_v53 }
 0x171   :  { %402 = vsyncpa [#allocation4], 1 }
 0x172   :  { %403 = vsyncpa [#allocation6], 1 }

</bundles_post_ra>
